<compile_context>
chip_gen: v6e
topology: v6e:2x2x1
jax: 0.10.0
libtpu: 0.0.40
codegen_flags: <defaults>
</compile_context>

<pallas_src>
import numpy as np
import jax
import jax.numpy as jnp
from jax.experimental import pallas as pl
from jax.experimental.pallas import tpu as pltpu

DIV_FLOW = 0.05


def _bilinear_matrix(out_size, in_size):
    """Row-stochastic (out_size, in_size) matrix replicating
    F.interpolate(mode='bilinear', align_corners=False) along one axis."""
    W = np.zeros((out_size, in_size), dtype=np.float32)
    if in_size == 1:
        W[:, 0] = 1.0
        return W
    scale = in_size / out_size
    for i in range(out_size):
        src = max((i + 0.5) * scale - 0.5, 0.0)     # PyTorch clamps negatives to 0
        i0 = min(int(np.floor(src)), in_size - 1)
        i1 = min(i0 + 1, in_size - 1)
        w1 = src - i0
        W[i, i0] += 1.0 - w1
        W[i, i1] += w1
    return W


def _make_fused_kernel(num_scales, channels, inv_counts):
    """Build a kernel handling one (batch, h_tile) grid step for all scales."""
    ns = num_scales
    C = channels

    def kernel(*refs):
        t_ref = refs[0]                          # (1, C, Hin, Win)  raw target
        o_refs = refs[1:1 + ns]                  # scale 0: (1,C,TH,Wo0); s>0: full
        wh_refs = refs[1 + ns:1 + 2 * ns]        # scale 0: (TH,Hin); s>0: (Ho,Hin)
        ww_refs = refs[1 + 2 * ns:1 + 3 * ns]    # (Win, Wo_s), f32
        out_ref = refs[1 + 3 * ns]               # (1, 1, 128) lane-dense partial

        h_tile = pl.program_id(1)

        # Up-cast the target once, in VMEM, right after the load (inputs may
        # arrive as bf16/fp16 - the cast is a free VPU op, the HBM read is
        # done at native width).
        t32 = [t_ref[0, c].astype(jnp.float32) for c in range(C)]  # (Hin, Win)

        def scale_partial(s):
            """Mean-EPE contribution of scale s for this grid step, as (1,1)."""
            o_blk = o_refs[s]
            Hrows = o_blk.shape[2]               # TH for s==0, full Ho_s otherwise
            Wout = o_blk.shape[3]
            wh = wh_refs[s][...]                 # (Hrows, Hin), div_flow folded in
            wwT = ww_refs[s][...]                # (Win, Wout)

            # H-resize first: lane dim = Win (lane-dense), one matmul per channel.
            a = jnp.concatenate(
                [jnp.dot(wh, t32[c], preferred_element_type=jnp.float32)
                 for c in range(C)],
                axis=0)                                             # (C*Hrows, Win)
            # Single channel-fused W-resize matmul.
            r = jnp.dot(a, wwT, preferred_element_type=jnp.float32)  # (C*Hrows, Wout)

            ssq = jnp.zeros((Hrows, Wout), jnp.float32)
            for c in range(C):                   # C is tiny (2 for flow): unrolled
                d = r[c * Hrows:(c + 1) * Hrows, :] - o_blk[0, c].astype(jnp.float32)
                ssq = ssq + d * d

            norm = jnp.sqrt(ssq)                                # (Hrows, Wout)
            row = jnp.sum(norm, axis=1, keepdims=True)          # (Hrows, 1)
            part = jnp.sum(row, axis=0, keepdims=True)          # (1, 1)
            return part * inv_counts[s]          # 1/(N*Ho*Wo) folded here

        # Finest scale: row-block of this h_tile (always computed).
        base = scale_partial(0)
        out_ref[...] = jnp.broadcast_to(base.reshape(1, 1, 1), out_ref.shape)

        # Coarse scales: full spatial extent, computed only on the first tile.
        if ns > 1:
            @pl.when(h_tile == 0)
            def _():
                coarse = jnp.zeros((1, 1), jnp.float32)
                for s in range(1, ns):
                    coarse = coarse + scale_partial(s)
                out_ref[...] = out_ref[...] + jnp.broadcast_to(
                    coarse.reshape(1, 1, 1), out_ref.shape)

    return kernel


def ours_loss(outputs, target, div_flow=DIV_FLOW):
    """Pallas implementation of OursLoss.forward: returns [epevalue]."""
    N, C, Hin, Win = (int(d) for d in target.shape)
    ns = len(outputs)

    whs, wwTs, inv_counts, out_hw = [], [], [], []
    for o in outputs:
        Ho, Wo = int(o.shape[2]), int(o.shape[3])
        # Fold div_flow into the H resize matrix: resize(div_flow*t) == (div_flow*Wh) t WwT
        whs.append(jnp.asarray(div_flow * _bilinear_matrix(Ho, Hin), dtype=jnp.float32))
        wwTs.append(jnp.asarray(_bilinear_matrix(Wo, Win).T, dtype=jnp.float32))
        inv_counts.append(1.0 / float(N * Ho * Wo))
        out_hw.append((Ho, Wo))

    # Tile Hout of the finest scale so the grid has enough parallel points for
    # v7x's two TensorCores even at N=1..2.  Row blocks must stay 8-sublane
    # aligned; fall back to a single tile otherwise.
    Ho0, Wo0 = out_hw[0]
    n_htiles = 1
    for cand in (8, 4, 2):
        if Ho0 % cand == 0 and (Ho0 // cand) % 8 == 0:
            n_htiles = cand
            break
    TH = Ho0 // n_htiles

    kernel = _make_fused_kernel(ns, C, inv_counts)

    in_specs = [pl.BlockSpec((1, C, Hin, Win), lambda n, h: (n, 0, 0, 0))]
    # outputs: finest scale is row-tiled along h, coarse scales are full blocks
    in_specs.append(pl.BlockSpec((1, C, TH, Wo0), lambda n, h: (n, 0, h, 0)))
    for Ho, Wo in out_hw[1:]:
        in_specs.append(pl.BlockSpec((1, C, Ho, Wo), lambda n, h: (n, 0, 0, 0)))
    # wh matrices (grid-invariant except the row-tiled finest scale)
    in_specs.append(pl.BlockSpec((TH, Hin), lambda n, h: (h, 0)))
    for w in whs[1:]:
        in_specs.append(pl.BlockSpec(w.shape, lambda n, h: (0, 0)))
    # wwT matrices (grid-invariant)
    for w in wwTs:
        in_specs.append(pl.BlockSpec(w.shape, lambda n, h: (0, 0)))

    partials = pl.pallas_call(
        kernel,
        out_shape=jax.ShapeDtypeStruct((N * n_htiles, 1, 128), jnp.float32),
        grid=(N, n_htiles),
        in_specs=in_specs,
        out_specs=pl.BlockSpec((1, 1, 128),
                               lambda n, h: (n * n_htiles + h, 0, 0)),
        compiler_params=pltpu.CompilerParams(
            dimension_semantics=("parallel", "parallel"),   # megacore on v7x
            vmem_limit_bytes=32 * 1024 * 1024),             # safe on v5e/v6e/v7x
    )(target, *outputs, *whs, *wwTs)     # native dtypes; cast happens in-kernel

    epevalue = jnp.sum(partials[:, 0, 0])
    return [epevalue]


def ours_loss_ref(outputs, target, div_flow=DIV_FLOW):
    """Pure-JAX reference using the same bilinear weight construction.
    NOTE: parity with torch F.interpolate rests on _bilinear_matrix; verify
    against torch separately before trusting in training."""
    target_scaled = (div_flow * target).astype(jnp.float32)
    total = jnp.zeros((), jnp.float32)
    for output_ in outputs:
        N, C, Hin, Win = target_scaled.shape
        _, _, Hout, Wout = output_.shape
        wh = jnp.asarray(_bilinear_matrix(Hout, Hin), dtype=jnp.float32)
        ww = jnp.asarray(_bilinear_matrix(Wout, Win), dtype=jnp.float32)
        r = jnp.einsum('ah,nchw,bw->ncab', wh, target_scaled, ww)
        d = r - output_.astype(jnp.float32)
        epe = jnp.sqrt(jnp.sum(d * d, axis=1))
        total = total + jnp.mean(epe)
    return total


if __name__ == "__main__":
    key = jax.random.PRNGKey(0)
    k_t, k0, k1, k2, k3 = jax.random.split(key, 5)

    N, C, H, W = 2, 2, 16, 16                  # flow target, NCHW
    target = jax.random.normal(k_t, (N, C, H, W), dtype=jnp.float32)
    outputs = [                                 # 4 pyramid scales (i = 0..3)
        jax.random.normal(k0, (N, C, 16, 16), dtype=jnp.float32),
        jax.random.normal(k1, (N, C, 8, 8), dtype=jnp.float32),
        jax.random.normal(k2, (N, C, 4, 4), dtype=jnp.float32),
        jax.random.normal(k3, (N, C, 2, 2), dtype=jnp.float32),
    ]

    loss = ours_loss(outputs, target)
    loss_val = jax.block_until_ready(loss[0])

    ref_val = jax.block_until_ready(ours_loss_ref(outputs, target))
    np.testing.assert_allclose(np.asarray(loss_val), np.asarray(ref_val),
                               rtol=1e-4, atol=1e-5)
    print("KERNEL_OK")
</pallas_src>

<mosaic_0001>
module attributes {stable_mosaic.version = 11 : i64} {
  func.func @kernel(%arg0: i32, %arg1: i32, %arg2: memref<1x2x16x16xf32, #tpu.memory_space<vmem>>, %arg3: memref<1x2x8x16xf32, #tpu.memory_space<vmem>>, %arg4: memref<1x2x8x8xf32, #tpu.memory_space<vmem>>, %arg5: memref<1x2x4x4xf32, #tpu.memory_space<vmem>>, %arg6: memref<1x2x2x2xf32, #tpu.memory_space<vmem>>, %arg7: memref<8x16xf32, #tpu.memory_space<vmem>>, %arg8: memref<8x16xf32, #tpu.memory_space<vmem>>, %arg9: memref<4x16xf32, #tpu.memory_space<vmem>>, %arg10: memref<2x16xf32, #tpu.memory_space<vmem>>, %arg11: memref<16x16xf32, #tpu.memory_space<vmem>>, %arg12: memref<16x8xf32, #tpu.memory_space<vmem>>, %arg13: memref<16x4xf32, #tpu.memory_space<vmem>>, %arg14: memref<16x2xf32, #tpu.memory_space<vmem>>, %arg15: memref<1x1x128xf32, #tpu.memory_space<vmem>>) attributes {dimension_semantics = [#tpu.dimension_semantics<parallel>, #tpu.dimension_semantics<parallel>], iteration_bounds = array<i64: 2, 2>, scalar_prefetch = 0 : i64, scratch_operands = 0 : i64, tpu.core_type = #tpu.core_type<tc>, window_params = [{transform_indices = @transform_0, window_bounds = array<i64: 1, 2, 16, 16>}, {transform_indices = @transform_1, window_bounds = array<i64: 1, 2, 8, 16>}, {transform_indices = @transform_2, window_bounds = array<i64: 1, 2, 8, 8>}, {transform_indices = @transform_3, window_bounds = array<i64: 1, 2, 4, 4>}, {transform_indices = @transform_4, window_bounds = array<i64: 1, 2, 2, 2>}, {transform_indices = @transform_5, window_bounds = array<i64: 8, 16>}, {pipeline_mode = #tpu.pipeline_mode<synchronous>, transform_indices = @transform_6, window_bounds = array<i64: 8, 16>}, {pipeline_mode = #tpu.pipeline_mode<synchronous>, transform_indices = @transform_7, window_bounds = array<i64: 4, 16>}, {pipeline_mode = #tpu.pipeline_mode<synchronous>, transform_indices = @transform_8, window_bounds = array<i64: 2, 16>}, {pipeline_mode = #tpu.pipeline_mode<synchronous>, transform_indices = @transform_9, window_bounds = array<i64: 16, 16>}, {pipeline_mode = #tpu.pipeline_mode<synchronous>, transform_indices = @transform_10, window_bounds = array<i64: 16, 8>}, {pipeline_mode = #tpu.pipeline_mode<synchronous>, transform_indices = @transform_11, window_bounds = array<i64: 16, 4>}, {pipeline_mode = #tpu.pipeline_mode<synchronous>, transform_indices = @transform_12, window_bounds = array<i64: 16, 2>}, {transform_indices = @transform_13, window_bounds = array<i64: 1, 1, 128>}]} {
    %c0 = arith.constant 0 : index
    %c0_0 = arith.constant 0 : index
    %c0_1 = arith.constant 0 : index
    %c0_2 = arith.constant 0 : index
    %0 = vector.load %arg2[%c0, %c0_0, %c0_1, %c0_2] : memref<1x2x16x16xf32, #tpu.memory_space<vmem>>, vector<1x1x16x16xf32>
    %1 = vector.shape_cast %0 : vector<1x1x16x16xf32> to vector<16x16xf32>
    %c0_3 = arith.constant 0 : index
    %c1 = arith.constant 1 : index
    %c0_4 = arith.constant 0 : index
    %c0_5 = arith.constant 0 : index
    %2 = vector.load %arg2[%c0_3, %c1, %c0_4, %c0_5] : memref<1x2x16x16xf32, #tpu.memory_space<vmem>>, vector<1x1x16x16xf32>
    %3 = vector.shape_cast %2 : vector<1x1x16x16xf32> to vector<16x16xf32>
    %c0_6 = arith.constant 0 : index
    %c0_7 = arith.constant 0 : index
    %4 = vector.load %arg7[%c0_6, %c0_7] : memref<8x16xf32, #tpu.memory_space<vmem>>, vector<8x16xf32>
    %c0_8 = arith.constant 0 : index
    %c0_9 = arith.constant 0 : index
    %5 = vector.load %arg11[%c0_8, %c0_9] : memref<16x16xf32, #tpu.memory_space<vmem>>, vector<16x16xf32>
    %cst = arith.constant dense<0.000000e+00> : vector<8x16xf32>
    %6 = tpu.matmul %4, %1, %cst {dimension_numbers = #tpu.dot_dimension_numbers<[1], [0], [0], [1], [0, 0, 1, 1], [], []>} : vector<8x16xf32>, vector<16x16xf32>, vector<8x16xf32> -> vector<8x16xf32>
    %cst_10 = arith.constant dense<0.000000e+00> : vector<8x16xf32>
    %7 = tpu.matmul %4, %3, %cst_10 {dimension_numbers = #tpu.dot_dimension_numbers<[1], [0], [0], [1], [0, 0, 1, 1], [], []>} : vector<8x16xf32>, vector<16x16xf32>, vector<8x16xf32> -> vector<8x16xf32>
    %8 = tpu.concatenate %6, %7 in 0 : vector<8x16xf32>, vector<8x16xf32> -> vector<16x16xf32>
    %cst_11 = arith.constant dense<0.000000e+00> : vector<16x16xf32>
    %9 = tpu.matmul %8, %5, %cst_11 {dimension_numbers = #tpu.dot_dimension_numbers<[1], [0], [0], [1], [0, 0, 1, 1], [], []>} : vector<16x16xf32>, vector<16x16xf32>, vector<16x16xf32> -> vector<16x16xf32>
    %cst_12 = arith.constant 0.000000e+00 : f32
    %10 = vector.broadcast %cst_12 : f32 to vector<8x16xf32>
    %11 = vector.extract_strided_slice %9 {offsets = [0, 0], sizes = [8, 16], strides = [1, 1]} : vector<16x16xf32> to vector<8x16xf32>
    %c0_13 = arith.constant 0 : index
    %c0_14 = arith.constant 0 : index
    %c0_15 = arith.constant 0 : index
    %c0_16 = arith.constant 0 : index
    %12 = vector.load %arg3[%c0_13, %c0_14, %c0_15, %c0_16] : memref<1x2x8x16xf32, #tpu.memory_space<vmem>>, vector<1x1x8x16xf32>
    %13 = vector.shape_cast %12 : vector<1x1x8x16xf32> to vector<8x16xf32>
    %14 = arith.subf %11, %13 : vector<8x16xf32>
    %15 = arith.mulf %14, %14 : vector<8x16xf32>
    %16 = arith.addf %10, %15 : vector<8x16xf32>
    %17 = vector.extract_strided_slice %9 {offsets = [8, 0], sizes = [8, 16], strides = [1, 1]} : vector<16x16xf32> to vector<8x16xf32>
    %c0_17 = arith.constant 0 : index
    %c1_18 = arith.constant 1 : index
    %c0_19 = arith.constant 0 : index
    %c0_20 = arith.constant 0 : index
    %18 = vector.load %arg3[%c0_17, %c1_18, %c0_19, %c0_20] : memref<1x2x8x16xf32, #tpu.memory_space<vmem>>, vector<1x1x8x16xf32>
    %19 = vector.shape_cast %18 : vector<1x1x8x16xf32> to vector<8x16xf32>
    %20 = arith.subf %17, %19 : vector<8x16xf32>
    %21 = arith.mulf %20, %20 : vector<8x16xf32>
    %22 = arith.addf %16, %21 : vector<8x16xf32>
    %23 = math.sqrt %22 : vector<8x16xf32>
    %cst_21 = arith.constant dense<0.000000e+00> : vector<8xf32>
    %24 = vector.multi_reduction <add>, %23, %cst_21 [1] : vector<8x16xf32> to vector<8xf32>
    %25 = vector.shape_cast %24 : vector<8xf32> to vector<8x1xf32>
    %cst_22 = arith.constant dense<0.000000e+00> : vector<1xf32>
    %26 = vector.multi_reduction <add>, %25, %cst_22 [0] : vector<8x1xf32> to vector<1xf32>
    %27 = vector.shape_cast %26 : vector<1xf32> to vector<1x1xf32>
    %cst_23 = arith.constant 0.001953125 : f32
    %28 = vector.broadcast %cst_23 : f32 to vector<1x1xf32>
    %29 = arith.mulf %27, %28 : vector<1x1xf32>
    %30 = vector.shape_cast %29 : vector<1x1xf32> to vector<1x1x1xf32>
    %31 = vector.shape_cast %30 : vector<1x1x1xf32> to vector<1x1x1xf32>
    %32 = vector.broadcast %31 : vector<1x1x1xf32> to vector<1x1x128xf32>
    %c0_24 = arith.constant 0 : index
    %c0_25 = arith.constant 0 : index
    %c0_26 = arith.constant 0 : index
    %33 = vector.load %arg15[%c0_24, %c0_25, %c0_26] : memref<1x1x128xf32, #tpu.memory_space<vmem>>, vector<1x1x128xf32>
    tpu.vector_store %arg15[%c0_24, %c0_25, %c0_26], %32 {strides = array<i32>} : memref<1x1x128xf32, #tpu.memory_space<vmem>>, vector<1x1x128xf32>,
    %c0_i32 = arith.constant 0 : i32
    %34 = arith.cmpi eq, %arg1, %c0_i32 : i32
    %35 = arith.extui %34 : i1 to i32
    %c0_i32_27 = arith.constant 0 : i32
    %36 = arith.cmpi ne, %35, %c0_i32_27 : i32
    scf.if %36 {
      %cst_28 = arith.constant 0.000000e+00 : f32
      %37 = vector.broadcast %cst_28 : f32 to vector<1x1xf32>
      %c0_29 = arith.constant 0 : index
      %c0_30 = arith.constant 0 : index
      %38 = vector.load %arg8[%c0_29, %c0_30] : memref<8x16xf32, #tpu.memory_space<vmem>>, vector<8x16xf32>
      %c0_31 = arith.constant 0 : index
      %c0_32 = arith.constant 0 : index
      %39 = vector.load %arg12[%c0_31, %c0_32] : memref<16x8xf32, #tpu.memory_space<vmem>>, vector<16x8xf32>
      %cst_33 = arith.constant dense<0.000000e+00> : vector<8x16xf32>
      %40 = tpu.matmul %38, %1, %cst_33 {dimension_numbers = #tpu.dot_dimension_numbers<[1], [0], [0], [1], [0, 0, 1, 1], [], []>} : vector<8x16xf32>, vector<16x16xf32>, vector<8x16xf32> -> vector<8x16xf32>
      %cst_34 = arith.constant dense<0.000000e+00> : vector<8x16xf32>
      %41 = tpu.matmul %38, %3, %cst_34 {dimension_numbers = #tpu.dot_dimension_numbers<[1], [0], [0], [1], [0, 0, 1, 1], [], []>} : vector<8x16xf32>, vector<16x16xf32>, vector<8x16xf32> -> vector<8x16xf32>
      %42 = tpu.concatenate %40, %41 in 0 : vector<8x16xf32>, vector<8x16xf32> -> vector<16x16xf32>
      %cst_35 = arith.constant dense<0.000000e+00> : vector<16x8xf32>
      %43 = tpu.matmul %42, %39, %cst_35 {dimension_numbers = #tpu.dot_dimension_numbers<[1], [0], [0], [1], [0, 0, 1, 1], [], []>} : vector<16x16xf32>, vector<16x8xf32>, vector<16x8xf32> -> vector<16x8xf32>
      %cst_36 = arith.constant 0.000000e+00 : f32
      %44 = vector.broadcast %cst_36 : f32 to vector<8x8xf32>
      %45 = vector.extract_strided_slice %43 {offsets = [0, 0], sizes = [8, 8], strides = [1, 1]} : vector<16x8xf32> to vector<8x8xf32>
      %c0_37 = arith.constant 0 : index
      %c0_38 = arith.constant 0 : index
      %c0_39 = arith.constant 0 : index
      %c0_40 = arith.constant 0 : index
      %46 = vector.load %arg4[%c0_37, %c0_38, %c0_39, %c0_40] : memref<1x2x8x8xf32, #tpu.memory_space<vmem>>, vector<1x1x8x8xf32>
      %47 = vector.shape_cast %46 : vector<1x1x8x8xf32> to vector<8x8xf32>
      %48 = arith.subf %45, %47 : vector<8x8xf32>
      %49 = arith.mulf %48, %48 : vector<8x8xf32>
      %50 = arith.addf %44, %49 : vector<8x8xf32>
      %51 = vector.extract_strided_slice %43 {offsets = [8, 0], sizes = [8, 8], strides = [1, 1]} : vector<16x8xf32> to vector<8x8xf32>
      %c0_41 = arith.constant 0 : index
      %c1_42 = arith.constant 1 : index
      %c0_43 = arith.constant 0 : index
      %c0_44 = arith.constant 0 : index
      %52 = vector.load %arg4[%c0_41, %c1_42, %c0_43, %c0_44] : memref<1x2x8x8xf32, #tpu.memory_space<vmem>>, vector<1x1x8x8xf32>
      %53 = vector.shape_cast %52 : vector<1x1x8x8xf32> to vector<8x8xf32>
      %54 = arith.subf %51, %53 : vector<8x8xf32>
      %55 = arith.mulf %54, %54 : vector<8x8xf32>
      %56 = arith.addf %50, %55 : vector<8x8xf32>
      %57 = math.sqrt %56 : vector<8x8xf32>
      %cst_45 = arith.constant dense<0.000000e+00> : vector<8xf32>
      %58 = vector.multi_reduction <add>, %57, %cst_45 [1] : vector<8x8xf32> to vector<8xf32>
      %59 = vector.shape_cast %58 : vector<8xf32> to vector<8x1xf32>
      %cst_46 = arith.constant dense<0.000000e+00> : vector<1xf32>
      %60 = vector.multi_reduction <add>, %59, %cst_46 [0] : vector<8x1xf32> to vector<1xf32>
      %61 = vector.shape_cast %60 : vector<1xf32> to vector<1x1xf32>
      %cst_47 = arith.constant 7.812500e-03 : f32
      %62 = vector.broadcast %cst_47 : f32 to vector<1x1xf32>
      %63 = arith.mulf %61, %62 : vector<1x1xf32>
      %64 = arith.addf %37, %63 : vector<1x1xf32>
      %c0_48 = arith.constant 0 : index
      %c0_49 = arith.constant 0 : index
      %65 = vector.load %arg9[%c0_48, %c0_49] : memref<4x16xf32, #tpu.memory_space<vmem>>, vector<4x16xf32>
      %c0_50 = arith.constant 0 : index
      %c0_51 = arith.constant 0 : index
      %66 = vector.load %arg13[%c0_50, %c0_51] : memref<16x4xf32, #tpu.memory_space<vmem>>, vector<16x4xf32>
      %cst_52 = arith.constant dense<0.000000e+00> : vector<4x16xf32>
      %67 = tpu.matmul %65, %1, %cst_52 {dimension_numbers = #tpu.dot_dimension_numbers<[1], [0], [0], [1], [0, 0, 1, 1], [], []>} : vector<4x16xf32>, vector<16x16xf32>, vector<4x16xf32> -> vector<4x16xf32>
      %cst_53 = arith.constant dense<0.000000e+00> : vector<4x16xf32>
      %68 = tpu.matmul %65, %3, %cst_53 {dimension_numbers = #tpu.dot_dimension_numbers<[1], [0], [0], [1], [0, 0, 1, 1], [], []>} : vector<4x16xf32>, vector<16x16xf32>, vector<4x16xf32> -> vector<4x16xf32>
      %69 = tpu.concatenate %67, %68 in 0 : vector<4x16xf32>, vector<4x16xf32> -> vector<8x16xf32>
      %cst_54 = arith.constant dense<0.000000e+00> : vector<8x4xf32>
      %70 = tpu.matmul %69, %66, %cst_54 {dimension_numbers = #tpu.dot_dimension_numbers<[1], [0], [0], [1], [0, 0, 1, 1], [], []>} : vector<8x16xf32>, vector<16x4xf32>, vector<8x4xf32> -> vector<8x4xf32>
      %cst_55 = arith.constant 0.000000e+00 : f32
      %71 = vector.broadcast %cst_55 : f32 to vector<4x4xf32>
      %72 = vector.extract_strided_slice %70 {offsets = [0, 0], sizes = [4, 4], strides = [1, 1]} : vector<8x4xf32> to vector<4x4xf32>
      %c0_56 = arith.constant 0 : index
      %c0_57 = arith.constant 0 : index
      %c0_58 = arith.constant 0 : index
      %c0_59 = arith.constant 0 : index
      %73 = vector.load %arg5[%c0_56, %c0_57, %c0_58, %c0_59] : memref<1x2x4x4xf32, #tpu.memory_space<vmem>>, vector<1x1x4x4xf32>
      %74 = vector.shape_cast %73 : vector<1x1x4x4xf32> to vector<4x4xf32>
      %75 = arith.subf %72, %74 : vector<4x4xf32>
      %76 = arith.mulf %75, %75 : vector<4x4xf32>
      %77 = arith.addf %71, %76 : vector<4x4xf32>
      %78 = vector.extract_strided_slice %70 {offsets = [4, 0], sizes = [4, 4], strides = [1, 1]} : vector<8x4xf32> to vector<4x4xf32>
      %c0_60 = arith.constant 0 : index
      %c1_61 = arith.constant 1 : index
      %c0_62 = arith.constant 0 : index
      %c0_63 = arith.constant 0 : index
      %79 = vector.load %arg5[%c0_60, %c1_61, %c0_62, %c0_63] : memref<1x2x4x4xf32, #tpu.memory_space<vmem>>, vector<1x1x4x4xf32>
      %80 = vector.shape_cast %79 : vector<1x1x4x4xf32> to vector<4x4xf32>
      %81 = arith.subf %78, %80 : vector<4x4xf32>
      %82 = arith.mulf %81, %81 : vector<4x4xf32>
      %83 = arith.addf %77, %82 : vector<4x4xf32>
      %84 = math.sqrt %83 : vector<4x4xf32>
      %cst_64 = arith.constant dense<0.000000e+00> : vector<4xf32>
      %85 = vector.multi_reduction <add>, %84, %cst_64 [1] : vector<4x4xf32> to vector<4xf32>
      %86 = vector.shape_cast %85 : vector<4xf32> to vector<4x1xf32>
      %cst_65 = arith.constant dense<0.000000e+00> : vector<1xf32>
      %87 = vector.multi_reduction <add>, %86, %cst_65 [0] : vector<4x1xf32> to vector<1xf32>
      %88 = vector.shape_cast %87 : vector<1xf32> to vector<1x1xf32>
      %cst_66 = arith.constant 3.125000e-02 : f32
      %89 = vector.broadcast %cst_66 : f32 to vector<1x1xf32>
      %90 = arith.mulf %88, %89 : vector<1x1xf32>
      %91 = arith.addf %64, %90 : vector<1x1xf32>
      %c0_67 = arith.constant 0 : index
      %c0_68 = arith.constant 0 : index
      %92 = vector.load %arg10[%c0_67, %c0_68] : memref<2x16xf32, #tpu.memory_space<vmem>>, vector<2x16xf32>
      %c0_69 = arith.constant 0 : index
      %c0_70 = arith.constant 0 : index
      %93 = vector.load %arg14[%c0_69, %c0_70] : memref<16x2xf32, #tpu.memory_space<vmem>>, vector<16x2xf32>
      %cst_71 = arith.constant dense<0.000000e+00> : vector<2x16xf32>
      %94 = tpu.matmul %92, %1, %cst_71 {dimension_numbers = #tpu.dot_dimension_numbers<[1], [0], [0], [1], [0, 0, 1, 1], [], []>} : vector<2x16xf32>, vector<16x16xf32>, vector<2x16xf32> -> vector<2x16xf32>
      %cst_72 = arith.constant dense<0.000000e+00> : vector<2x16xf32>
      %95 = tpu.matmul %92, %3, %cst_72 {dimension_numbers = #tpu.dot_dimension_numbers<[1], [0], [0], [1], [0, 0, 1, 1], [], []>} : vector<2x16xf32>, vector<16x16xf32>, vector<2x16xf32> -> vector<2x16xf32>
      %96 = tpu.concatenate %94, %95 in 0 : vector<2x16xf32>, vector<2x16xf32> -> vector<4x16xf32>
      %cst_73 = arith.constant dense<0.000000e+00> : vector<4x2xf32>
      %97 = tpu.matmul %96, %93, %cst_73 {dimension_numbers = #tpu.dot_dimension_numbers<[1], [0], [0], [1], [0, 0, 1, 1], [], []>} : vector<4x16xf32>, vector<16x2xf32>, vector<4x2xf32> -> vector<4x2xf32>
      %cst_74 = arith.constant 0.000000e+00 : f32
      %98 = vector.broadcast %cst_74 : f32 to vector<2x2xf32>
      %99 = vector.extract_strided_slice %97 {offsets = [0, 0], sizes = [2, 2], strides = [1, 1]} : vector<4x2xf32> to vector<2x2xf32>
      %c0_75 = arith.constant 0 : index
      %c0_76 = arith.constant 0 : index
      %c0_77 = arith.constant 0 : index
      %c0_78 = arith.constant 0 : index
      %100 = vector.load %arg6[%c0_75, %c0_76, %c0_77, %c0_78] : memref<1x2x2x2xf32, #tpu.memory_space<vmem>>, vector<1x1x2x2xf32>
      %101 = vector.shape_cast %100 : vector<1x1x2x2xf32> to vector<2x2xf32>
      %102 = arith.subf %99, %101 : vector<2x2xf32>
      %103 = arith.mulf %102, %102 : vector<2x2xf32>
      %104 = arith.addf %98, %103 : vector<2x2xf32>
      %105 = vector.extract_strided_slice %97 {offsets = [2, 0], sizes = [2, 2], strides = [1, 1]} : vector<4x2xf32> to vector<2x2xf32>
      %c0_79 = arith.constant 0 : index
      %c1_80 = arith.constant 1 : index
      %c0_81 = arith.constant 0 : index
      %c0_82 = arith.constant 0 : index
      %106 = vector.load %arg6[%c0_79, %c1_80, %c0_81, %c0_82] : memref<1x2x2x2xf32, #tpu.memory_space<vmem>>, vector<1x1x2x2xf32>
      %107 = vector.shape_cast %106 : vector<1x1x2x2xf32> to vector<2x2xf32>
      %108 = arith.subf %105, %107 : vector<2x2xf32>
      %109 = arith.mulf %108, %108 : vector<2x2xf32>
      %110 = arith.addf %104, %109 : vector<2x2xf32>
      %111 = math.sqrt %110 : vector<2x2xf32>
      %cst_83 = arith.constant dense<0.000000e+00> : vector<2xf32>
      %112 = vector.multi_reduction <add>, %111, %cst_83 [1] : vector<2x2xf32> to vector<2xf32>
      %113 = vector.shape_cast %112 : vector<2xf32> to vector<2x1xf32>
      %cst_84 = arith.constant dense<0.000000e+00> : vector<1xf32>
      %114 = vector.multi_reduction <add>, %113, %cst_84 [0] : vector<2x1xf32> to vector<1xf32>
      %115 = vector.shape_cast %114 : vector<1xf32> to vector<1x1xf32>
      %cst_85 = arith.constant 1.250000e-01 : f32
      %116 = vector.broadcast %cst_85 : f32 to vector<1x1xf32>
      %117 = arith.mulf %115, %116 : vector<1x1xf32>
      %118 = arith.addf %91, %117 : vector<1x1xf32>
      %c0_86 = arith.constant 0 : index
      %c0_87 = arith.constant 0 : index
      %c0_88 = arith.constant 0 : index
      %119 = vector.load %arg15[%c0_86, %c0_87, %c0_88] : memref<1x1x128xf32, #tpu.memory_space<vmem>>, vector<1x1x128xf32>
      %120 = vector.shape_cast %118 : vector<1x1xf32> to vector<1x1x1xf32>
      %121 = vector.shape_cast %120 : vector<1x1x1xf32> to vector<1x1x1xf32>
      %122 = vector.broadcast %121 : vector<1x1x1xf32> to vector<1x1x128xf32>
      %123 = arith.addf %119, %122 : vector<1x1x128xf32>
      %c0_89 = arith.constant 0 : index
      %c0_90 = arith.constant 0 : index
      %c0_91 = arith.constant 0 : index
      %124 = vector.load %arg15[%c0_89, %c0_90, %c0_91] : memref<1x1x128xf32, #tpu.memory_space<vmem>>, vector<1x1x128xf32>
      tpu.vector_store %arg15[%c0_89, %c0_90, %c0_91], %123 {strides = array<i32>} : memref<1x1x128xf32, #tpu.memory_space<vmem>>, vector<1x1x128xf32>,
    } else {
    }
    return
  }
  func.func @transform_0(%arg0: i32, %arg1: i32) -> (i32, i32, i32, i32) {
    %c0_i32 = arith.constant 0 : i32
    %c0_i32_0 = arith.constant 0 : i32
    %c0_i32_1 = arith.constant 0 : i32
    %c0_i32_2 = arith.constant 0 : i32
    return %arg0, %c0_i32, %c0_i32_0, %c0_i32_1 : i32, i32, i32, i32
  }
  func.func @transform_1(%arg0: i32, %arg1: i32) -> (i32, i32, i32, i32) {
    %c0_i32 = arith.constant 0 : i32
    %c0_i32_0 = arith.constant 0 : i32
    %c0_i32_1 = arith.constant 0 : i32
    return %arg0, %c0_i32, %arg1, %c0_i32_0 : i32, i32, i32, i32
  }
  func.func @transform_2(%arg0: i32, %arg1: i32) -> (i32, i32, i32, i32) {
    %c0_i32 = arith.constant 0 : i32
    %c0_i32_0 = arith.constant 0 : i32
    %c0_i32_1 = arith.constant 0 : i32
    %c0_i32_2 = arith.constant 0 : i32
    return %arg0, %c0_i32, %c0_i32_0, %c0_i32_1 : i32, i32, i32, i32
  }
  func.func @transform_3(%arg0: i32, %arg1: i32) -> (i32, i32, i32, i32) {
    %c0_i32 = arith.constant 0 : i32
    %c0_i32_0 = arith.constant 0 : i32
    %c0_i32_1 = arith.constant 0 : i32
    %c0_i32_2 = arith.constant 0 : i32
    return %arg0, %c0_i32, %c0_i32_0, %c0_i32_1 : i32, i32, i32, i32
  }
  func.func @transform_4(%arg0: i32, %arg1: i32) -> (i32, i32, i32, i32) {
    %c0_i32 = arith.constant 0 : i32
    %c0_i32_0 = arith.constant 0 : i32
    %c0_i32_1 = arith.constant 0 : i32
    %c0_i32_2 = arith.constant 0 : i32
    return %arg0, %c0_i32, %c0_i32_0, %c0_i32_1 : i32, i32, i32, i32
  }
  func.func @transform_5(%arg0: i32, %arg1: i32) -> (i32, i32) {
    %c0_i32 = arith.constant 0 : i32
    %c0_i32_0 = arith.constant 0 : i32
    return %arg1, %c0_i32 : i32, i32
  }
  func.func @transform_6(%arg0: i32, %arg1: i32) -> (i32, i32) {
    %c0_i32 = arith.constant 0 : i32
    %c0_i32_0 = arith.constant 0 : i32
    %c0_i32_1 = arith.constant 0 : i32
    return %c0_i32, %c0_i32_0 : i32, i32
  }
  func.func @transform_7(%arg0: i32, %arg1: i32) -> (i32, i32) {
    %c0_i32 = arith.constant 0 : i32
    %c0_i32_0 = arith.constant 0 : i32
    %c0_i32_1 = arith.constant 0 : i32
    return %c0_i32, %c0_i32_0 : i32, i32
  }
  func.func @transform_8(%arg0: i32, %arg1: i32) -> (i32, i32) {
    %c0_i32 = arith.constant 0 : i32
    %c0_i32_0 = arith.constant 0 : i32
    %c0_i32_1 = arith.constant 0 : i32
    return %c0_i32, %c0_i32_0 : i32, i32
  }
  func.func @transform_9(%arg0: i32, %arg1: i32) -> (i32, i32) {
    %c0_i32 = arith.constant 0 : i32
    %c0_i32_0 = arith.constant 0 : i32
    %c0_i32_1 = arith.constant 0 : i32
    return %c0_i32, %c0_i32_0 : i32, i32
  }
  func.func @transform_10(%arg0: i32, %arg1: i32) -> (i32, i32) {
    %c0_i32 = arith.constant 0 : i32
    %c0_i32_0 = arith.constant 0 : i32
    %c0_i32_1 = arith.constant 0 : i32
    return %c0_i32, %c0_i32_0 : i32, i32
  }
  func.func @transform_11(%arg0: i32, %arg1: i32) -> (i32, i32) {
    %c0_i32 = arith.constant 0 : i32
    %c0_i32_0 = arith.constant 0 : i32
    %c0_i32_1 = arith.constant 0 : i32
    return %c0_i32, %c0_i32_0 : i32, i32
  }
  func.func @transform_12(%arg0: i32, %arg1: i32) -> (i32, i32) {
    %c0_i32 = arith.constant 0 : i32
    %c0_i32_0 = arith.constant 0 : i32
    %c0_i32_1 = arith.constant 0 : i32
    return %c0_i32, %c0_i32_0 : i32, i32
  }
  func.func @transform_13(%arg0: i32, %arg1: i32) -> (i32, i32, i32) {
    %c2_i32 = arith.constant 2 : i32
    %0 = arith.muli %arg0, %c2_i32 : i32
    %1 = arith.addi %0, %arg1 : i32
    %c0_i32 = arith.constant 0 : i32
    %c0_i32_0 = arith.constant 0 : i32
    %c0_i32_1 = arith.constant 0 : i32
    return %1, %c0_i32, %c0_i32_0 : i32, i32, i32
  }
}

</mosaic_0001>

<bundles_post_ra>
// kernel: tpu_custom_call.1
= control target key start
LH: loop header
LB: loop body
LE: loop exit
PB: predicated region body
PF: predicated region fallthrough
CT: control target
= control target key end

     0   :  { %s3160_s0 = inlined_call_operand.hbm [shape: f32[2,2,16,16], index: 0, kind: input, shape index: {}]   ;;  %s3161_s1 = inlined_call_operand.hbm [shape: f32[2,2,16,16], index: 1, kind: input, shape index: {}]   ;;  %s3162_s2 = inlined_call_operand.vmem [shape: f32[2,2,8,8], index: 2, kind: input, shape index: {}]   ;;  %s3163_s3 = inlined_call_operand.vmem [shape: f32[2,2,4,4], index: 3, kind: input, shape index: {}]   ;;  %s3164_s4 = inlined_call_operand.hbm [shape: f32[2,2,2,2], index: 4, kind: input, shape index: {}]   ;;  %s3165_s5 = inlined_call_operand.vmem [shape: f32[16,16], index: 5, kind: input, shape index: {}]   ;;  %s3166_s6 = inlined_call_operand.hbm [shape: f32[8,16], index: 6, kind: input, shape index: {}]   ;;  %s3167_s7 = inlined_call_operand.hbm [shape: f32[4,16], index: 7, kind: input, shape index: {}]   ;;  %s3168_s8 = inlined_call_operand.vmem [shape: f32[2,16], index: 8, kind: input, shape index: {}]   ;;  %s3169_s9 = inlined_call_operand.hbm [shape: f32[16,16], index: 9, kind: input, shape index: {}]   ;;  %s3170_s10 = inlined_call_operand.vmem [shape: f32[16,8], index: 10, kind: input, shape index: {}]   ;;  %s3171_s11 = inlined_call_operand.vmem [shape: f32[16,4], index: 11, kind: input, shape index: {}]   ;;  %s3172_s12 = inlined_call_operand.vmem [shape: f32[16,2], index: 12, kind: input, shape index: {}]   ;;  %s3173_s13 = inlined_call_operand.hbm [shape: f32[4,1,128], index: 13, kind: output, shape index: {}]  }
   0x1   :  { %3201 = sst [smem:[#allocation32_spill]] %s3160_s0 }
   0x2   :  { %3202 = sst [smem:[#allocation33_spill]] %s3161_s1 }
   0x3   :  { %3203 = sst [smem:[#allocation34_spill]] %s3162_s2 }
   0x4   :  { %3204 = sst [smem:[#allocation35_spill]] %s3163_s3 }
   0x5   :  { %3205 = sst [smem:[#allocation36_spill]] %s3164_s4 }
   0x6   :  { %3206 = sst [smem:[#allocation37_spill]] %s3165_s5 }
   0x7   :  { %3207 = sst [smem:[#allocation38_spill]] %s3166_s6 }
   0x8   :  { %3208 = sst [smem:[#allocation39_spill]] %s3167_s7 }
   0x9   :  { %3209 = sst [smem:[#allocation40_spill]] %s3168_s8 }
   0xa   :  { %3210 = sst [smem:[#allocation41_spill]] %s3169_s9 }
   0xb   :  { %3211 = sst [smem:[#allocation42_spill]] %s3170_s10 }
   0xc   :  { %3212 = sst [smem:[#allocation43_spill]] %s3171_s11 }
   0xd   :  { %3213 = sst [smem:[#allocation44_spill]] %s3172_s12 }
   0xe   :  { %3214 = sst [smem:[#allocation45_spill]] %s3173_s13 }
   0xf   :  { %18 = vsyncpa [#allocation3], 0 }
  0x10   :  { %20 = vsyncpa [#allocation3 + $0x1], 0 }
  0x11   :  { %21 = vsyncpa [#allocation6], 0 }
  0x12   :  { %23 = vsyncpa [#allocation6 + $0x1], 0 }
  0x13   :  { %24 = vsyncpa [#allocation9], 0 }
  0x14   :  { %25 = vsyncpa [#allocation12], 0 }
  0x15   :  { %26 = vsyncpa [#allocation4], 0 }
  0x16   :  { %28 = vsyncpa [#allocation4 + $0x1], 0  ;;  %s2672_s25 = smov 0   ;;  %s2674_s26 = smov 0  }
  0x17   :  { %s2676_s27 = smov 0   ;;  %s2678_s28 = smov 0  }
  0x18   :  { %s2680_s29 = smov 0   ;;  %s2682_s30 = smov 0  }
  0x19   :  { %s2684_s14 = smov 0   ;;  %s2686_s15 = smov 0  }
  0x1a   :  { %s2688_s16 = smov 0   ;;  %s2690_s17 = smov 0  }
  0x1b   :  { %s2692_s18 = smov 0   ;;  %s2694_s19 = smov 0  }
  0x1c   :  { %s2696_s20 = smov 0   ;;  %s2698_s21 = smov 0  }
  0x1d LB: > { %3215 = sst [smem:[#allocation20_spill]] %s2532_s25  ;;  %s2739_s22 = sadd.s32 4294967295, %s2584_s21   ;;  %s2584_s21 = sphi %s2698_s21, %s34_s21   ;;  %s2580_s20 = sphi %s2696_s20, %s3293_s20   ;;  %s2576_s19 = sphi %s2694_s19, %s3292_s19   ;;  %s2572_s18 = sphi %s2692_s18, %s3291_s18   ;;  %s2568_s17 = sphi %s2690_s17, %s3290_s17   ;;  %s2564_s16 = sphi %s2688_s16, %s3289_s16   ;;  %s2560_s15 = sphi %s2686_s15, %s3288_s15   ;;  %s2556_s14 = sphi %s2684_s14, %s3287_s14   ;;  %s2552_s30 = sphi %s2682_s30, %s3286_s30   ;;  %s2548_s29 = sphi %s2680_s29, %s3285_s29   ;;  %s2544_s28 = sphi %s2678_s28, %s3279_s28   ;;  %s2540_s27 = sphi %s2676_s27, %s3284_s27   ;;  %s2536_s26 = sphi %s2674_s26, %s3283_s26   ;;  %s2532_s25 = sphi %s2672_s25, %s3282_s25  }
  0x1e   : > { %3216 = sst [smem:[#allocation21_spill]] %s2536_s26  ;;  %s1898_s23 = sadd.s32 4294967294, %s2584_s21  }
  0x1f   : > { %3217 = sst [smem:[#allocation22_spill]] %s2548_s29  ;;  %p66_p0 = scmp.ne.s32.totalorder %s2560_s15, %s2556_s14 }
  0x20   : > { %3218 = sst [smem:[#allocation23_spill]] %s2568_s17  ;;  %p3196_p1 = scmp.eq.s32.totalorder %s2739_s22, 0 }
  0x21   : > { %3219 = sst [smem:[#allocation24_spill]] %s2572_s18  ;;  %p94_p2 = scmp.ne.s32.totalorder %s2548_s29, %s2544_s28 }
  0x22   : > { %3220 = sst [smem:[#allocation25_spill]] %s2739_s22  ;;  %p2748_p3 = por %p3196_p1, %p66_p0 }
  0x23   : > { %p372_p4 = scmp.ne.s32.totalorder %s2540_s27, %s2536_s26  ;;  %p2756_p5 = por %p94_p2, %p3196_p1 }
  0x24   : > { %s3221_s13 = scalar_select %p2748_p3, 1, 0 }
  0x25   : > { %s3223_s12 = scalar_select %p2756_p5, 1, 0 }
  0x26   : > { %3222 = sst [smem:[#allocation26_spill]] %s3221_s13  ;;  %p373_p6 = scmp.eq.s32.totalorder %s2739_s22, 3 }
  0x27   : > { %3224 = sst [smem:[#allocation27_spill]] %s3223_s12  ;;  %p378_p7 = scmp.ne.s32.totalorder %s2536_s26, %s2532_s25 }
  0x28   : > { %p379_p8 = scmp.eq.s32.totalorder %s1898_s23, 3  ;;  %p2763_p9 = por %p373_p6, %p372_p4 }
  0x29   : > { %p1901_p10 = scmp.ge.s32.totalorder %s2584_s21, 1  ;;  %p386_p12 = scmp.lt.s32.totalorder %s2584_s21, 5 }
  0x2a   : > { %s3225_s14 = scalar_select %p2763_p9, 1, 0 }
  0x2b   : > { %p2768_p11 = por %p379_p8, %p378_p7  ;;  %p2773_p13 = pnand %p1901_p10, %p386_p12 }
  0x2c   : > { %3226 = sst [smem:[#allocation28_spill]] %s3225_s14  ;;  %s2586_s8 = smov [#allocation8]  }
  0x2d   : > { %s3227_s28 = scalar_select %p2768_p11, 1, 0 }
  0x2e   : > { %s3229_s24 = scalar_select %p2773_p13, 1, 0 }
  0x2f   : > { %3228 = sst [smem:[#allocation29_spill]] %s3227_s28  ;;  %s399_s11 = sshll.u32 %s2586_s8, 4  ;;  %s400_s11 = int_to_ptr.vmem [resolvable:$true] %s399_s11 }
  0x30   : > { %3230 = sst [smem:[#allocation30_spill]] %s3229_s24  ;;  %p2098_p0 = pneg %p2773_p13 }
  0x31   : > { %s43_s25 = sadd.s32 1, %s2576_s19  ;;  %s2273_s28 = scalar_lea.vmem %s400_s11, 128 }
  0x32   : > { %p2781_p2 = pnand %p2098_p0, %p3196_p1  ;;  %p2274_p6 = scmp.ne.s32.totalorder %s400_s11, %s2273_s28 }
  0x33   : > { %p2281_p10 = scmp.lt.s32.totalorder %s400_s11, %s400_s11  ;;  %p2282_p12 = scmp.lt.s32.totalorder %s2273_s28, %s2273_s28 }
  0x34   : > { %p2264_p4 = pneg %p2781_p2 }
  0x35   : > { %p2283_p11 = por %p2282_p12, %p2281_p10 }
  0x36   : > { %p2276_p7 = pnand %p2274_p6, %p2264_p4 }
  0x38   : > { %p2277_p8 = pneg %p2276_p7 }
  0x3a   : > { %p2284_p9 = pnand %p2283_p11, %p2277_p8 }
  0x3c   : > { %2287 = shalt.err (!%p2284_p9)
}
  0x3d   : > { %s3232_s6 = sld [smem:[#allocation38_spill]]  ;;  %p44_p0 = scmp.ge.s32.totalorder %s43_s25, 2 }
  0x3e   : > { %s46_s28 = sadd.s32 1, %s2580_s20  ;;  %p3198_p9 = scmp.eq.s32.totalorder %s2584_s21, 0 }
  0x3f   : > { %s81_s10 = sadd.s32 1, %s2552_s30  ;;  %s3295_s25 = smov (%p44_p0, %s43_s25), 0 }
  0x40   : > { %s3297_s28 = smov (!%p44_p0, %s46_s28), %s2580_s20  ;;  %s77_s14 = ssub.s32 %s2576_s19, %s3295_s25 }
  0x41   : > { %p88_p11 = scmp.ne.s32.totalorder %s2552_s30, %s2548_s29  ;;  %p48_p6 = scmp.ge.s32.totalorder %s3297_s28, 2 }
  0x42   : > { %s1899_s8 = sshll.u32 %s2580_s20, 1  ;;  %p3197_p12 = scmp.lt.s32.totalorder %s2584_s21, 4 }
  0x43   : > { %2101 = dma.hbm_to_vmem [thread:$0]  (!%p2781_p2), %s3232_s6, 128, %s400_s11, [#allocation9]  }
  0x44   : > { %p2809_p7 = por %p88_p11, %p3198_p9  ;;  %s356_s6 = sadd.s32 %s2576_s19, %s1899_s8 }
  0x45   : > { %s3299_s28 = smov (%p48_p6, %s3297_s28), 0  ;;  %s3235_s8 = sadd.s32 1, %s2540_s27 }
  0x46   : > { %3234 = sst [smem:[#allocation31_spill]] %s3299_s28  ;;  %s2818_s26 = ssub.s32 %s2580_s20, %s3299_s28 }
  0x47   : > { %s1900_s5 = sshll.u32 %s3299_s28, 1  ;;  %s78_s3 = sor.u32 %s77_s14, %s2818_s26 }
  0x48   : > { %s358_s2 = sadd.s32 %s1900_s5, %s3295_s25  ;;  %p79_p8 = scmp.eq.s32.totalorder %s78_s3, 0 }
  0x49   : > { %s359_s17 = ssub.s32 %s356_s6, %s358_s2  ;;  %s467_s29 = sand.u32 1, %s2584_s21  }
  0x4a   : > { %p360_p10 = scmp.eq.s32.totalorder %s359_s17, 0  ;;  %s469_s22 = sand.u32 1, %s2552_s30  }
  0x4b   : > { %s2825_s18 = scalar_select %p79_p8, %s2552_s30, %s81_s10  }
  0x4c   : > { %s2830_s12 = scalar_select %p360_p10, %s2540_s27, %s3235_s8  }
  0x4d   : > { %s1909_s13 = sshll.u32 %s469_s22, 4  ;;  %s1910_s24 = sshll.u32 %s2580_s20, 2 }
  0x4e   : > { %s476_s4 = sadd.s32 %s2576_s19, %s1910_s24  ;;  %s471_s0 = scalar_lea.vmem [#allocation5], %s1909_s13 }
  0x4f   : > { %s479_s28 = sshll.u32 %s471_s0, 4  ;;  %s1911_s14 = sshll.u32 %s476_s4, 7  ;;  %s480_s28 = int_to_ptr.vmem [resolvable:$true] %s479_s28 }
  0x50   : > { %s3236_s1 = sld [smem:[#allocation33_spill]]  ;;  %p2843_p0 = pnand %p3197_p12, %p2809_p7 }
  0x51   : > { %s2587_s10 = smov [#allocation10]   ;;  %s2847_s22 = scalar_lea.sflag [#allocation6], %s467_s29 }
  0x52   : > { %s410_s17 = sshll.u32 %s2587_s10, 4  ;;  %p2290_p11 = pneg %p2843_p0  ;;  %s411_s17 = int_to_ptr.vmem [resolvable:$true] %s410_s17 }
  0x53   : > { %s2301_s0 = scalar_lea.vmem %s480_s28, 256  ;;  %s2588_s4 = smov [#allocation5]  }
  0x54   : > { %p2302_p6 = scmp.ne.s32.totalorder %s480_s28, %s2301_s0  ;;  %s2306_s13 = sshll.u32 %s2588_s4, 4  ;;  %s2307_s13 = int_to_ptr.vmem [resolvable:$false] %s2306_s13 }
  0x55   : > { %s2308_s24 = scalar_lea.vmem %s2307_s13, 512  ;;  %p2309_p1 = scmp.lt.s32.totalorder %s480_s28, %s2307_s13 }
  0x56   : > { %s478_s2 = scalar_lea.hbm %s3236_s1, %s1911_s14  ;;  %p2304_p8 = pnand %p2302_p6, %p2290_p11 }
  0x57   : > { %p2310_p7 = scmp.lt.s32.totalorder %s2308_s24, %s2301_s0 }
  0x58   : > { %p2305_p10 = pneg %p2304_p8 }
  0x59   : > { %p2311_p12 = por %p2310_p7, %p2309_p1 }
  0x5b   : > { %p2312_p9 = pnand %p2311_p12, %p2305_p10 }
  0x5d   : > { %2315 = shalt.err (!%p2312_p9)
}
  0x5e   : > { %s2589_s11 = smov 256   ;;  %s2590_s29 = smov 128  }
  0x5f   : > { %s2591_s8 = smov 8   ;;  %s2327_s14 = scalar_lea.vmem %s411_s17, 64 }
  0x60   : > { %2114 = dma.hbm_to_vmem [thread:$0]  (!%p2843_p0), %s478_s2, 256, %s480_s28, %s2847_s22, %s2589_s11, %s2590_s29, %s2591_s8  }
  0x61   : > { %p2328_p11 = scmp.ne.s32.totalorder %s411_s17, %s2327_s14  ;;  %p2335_p1 = scmp.lt.s32.totalorder %s411_s17, %s411_s17 }
  0x62   : > { %p2336_p12 = scmp.lt.s32.totalorder %s2327_s14, %s2327_s14 }
  0x63   : > { %p2330_p6 = pnand %p2328_p11, %p2264_p4 }
  0x64   : > { %p2337_p9 = por %p2336_p12, %p2335_p1 }
  0x65   : > { %p2331_p8 = pneg %p2330_p6 }
  0x67   : > { %p2338_p10 = pnand %p2337_p9, %p2331_p8 }
  0x69   : > { %2341 = shalt.err (!%p2338_p10)
}
  0x6a   : > { %s3238_s7 = sld [smem:[#allocation39_spill]]  ;;  %s2592_s28 = smov [#allocation11]  }
  0x6b   : > { %s423_s2 = sshll.u32 %s2592_s28, 4  ;;  %s424_s2 = int_to_ptr.vmem [resolvable:$true] %s423_s2 }
  0x6c   : > { %s2353_s6 = scalar_lea.vmem %s424_s2, 256  ;;  %p2361_p6 = scmp.lt.s32.totalorder %s424_s2, %s424_s2 }
  0x6d   : > { %p2354_p0 = scmp.ne.s32.totalorder %s424_s2, %s2353_s6  ;;  %p2362_p1 = scmp.lt.s32.totalorder %s2353_s6, %s2353_s6 }
  0x6f   : > { %p2356_p7 = pnand %p2354_p0, %p2264_p4  ;;  %p2363_p8 = por %p2362_p1, %p2361_p6 }
  0x70   : > { %2104 = dma.hbm_to_vmem [thread:$0]  (!%p2781_p2), %s3238_s7, 64, %s411_s17, [#allocation9]  }
  0x71   : > { %p2357_p11 = pneg %p2356_p7 }
  0x73   : > { %p2364_p12 = pnand %p2363_p8, %p2357_p11 }
  0x75   : > { %2367 = shalt.err (!%p2364_p12)
}
  0x76   : > { %s3239_s9 = sld [smem:[#allocation41_spill]]  ;;  %p51_p4 = scmp.eq.s32.totalorder %s2818_s26, 0 }
  0x77   : > { %s53_s0 = sadd.s32 1, %s2564_s16  ;;  %p60_p9 = scmp.ne.s32.totalorder %s2564_s16, %s2560_s15 }
  0x78   : > { %s2880_s23 = sand.u32 1, %s2564_s16   ;;  %p3240_p10 = scmp.eq.s32.totalorder %s2584_s21, 0 }
  0x79   : > { %s2883_s4 = scalar_select %p51_p4, %s2564_s16, %s53_s0  }
  0x7a   : > { %p62_p0 = por %p3240_p10, %p60_p9  ;;  %s1906_s13 = sshll.u32 %s2880_s23, 5 }
  0x7b   : > { %s1952_s24 = sshll.u32 %s2580_s20, 9  ;;  %s3241_s3 = sld [smem:[#allocation32_spill]] }
  0x7c   : > { %2107 = dma.hbm_to_vmem [thread:$0]  (!%p2781_p2), %s3239_s9, 256, %s424_s2, [#allocation12], %s2590_s29, %s2590_s29, %s2591_s8  }
  0x7d   : > { %s450_s28 = scalar_lea.vmem [#allocation2], %s1906_s13  ;;  %p3242_p2 = scmp.lt.s32.totalorder %s2584_s21, 4 }
  0x7e   : > { %s457_s2 = sshll.u32 %s450_s28, 4  ;;  %s1912_s6 = sshll.u32 %s2880_s23, 2  ;;  %s458_s2 = int_to_ptr.vmem [resolvable:$true] %s457_s2 }
  0x7f   : > { %p2894_p7 = pnand %p3242_p2, %p62_p0  ;;  %s447_s10 = scalar_lea.sflag [#allocation3], %s2880_s23 }
  0x80   : > { %s2381_s17 = scalar_lea.vmem %s458_s2, 512  ;;  %s2593_s0 = smov [#allocation2]  }
  0x81   : > { %s456_s5 = scalar_lea.hbm %s3241_s3, %s1952_s24  ;;  %p2370_p11 = pneg %p2894_p7 }
  0x82   : > { %p2382_p6 = scmp.ne.s32.totalorder %s458_s2, %s2381_s17  ;;  %s2386_s13 = sshll.u32 %s2593_s0, 4  ;;  %s2387_s13 = int_to_ptr.vmem [resolvable:$false] %s2386_s13 }
  0x83   : > { %s2388_s24 = scalar_lea.vmem %s2387_s13, 1024  ;;  %p2389_p12 = scmp.lt.s32.totalorder %s458_s2, %s2387_s13 }
  0x84   : > { %p2384_p1 = pnand %p2382_p6, %p2370_p11  ;;  %p2390_p4 = scmp.lt.s32.totalorder %s2388_s24, %s2381_s17 }
  0x86   : > { %p2385_p8 = pneg %p2384_p1  ;;  %p2391_p9 = por %p2390_p4, %p2389_p12 }
  0x88   : > { %p2392_p10 = pnand %p2391_p9, %p2385_p8 }
  0x8a   : > { %2395 = shalt.err (!%p2392_p10)
}
  0x8b   : > { %2111 = dma.hbm_to_vmem [thread:$0]  (!%p2894_p7), %s456_s5, 512, %s458_s2, %s447_s10, %s2590_s29, %s2590_s29, %s2591_s8  }
  0x8c   : > { %s1953_s23 = sshll.u32 %s2580_s20, 6  ;;  %s509_s11 = scalar_lea.vmem [#allocation7], %s1912_s6 }
  0x8d   : > { %s516_s14 = sshll.u32 %s509_s11, 4  ;;  %s3244_s0 = sld [smem:[#allocation36_spill]]  ;;  %s517_s14 = int_to_ptr.vmem [resolvable:$true] %s516_s14 }
  0x8e   : > { %s2409_s17 = scalar_lea.vmem %s517_s14, 64  ;;  %s2594_s13 = smov [#allocation7]  }
  0x8f   : > { %p2410_p0 = scmp.ne.s32.totalorder %s517_s14, %s2409_s17  ;;  %s2414_s24 = sshll.u32 %s2594_s13, 4  ;;  %s2415_s24 = int_to_ptr.vmem [resolvable:$false] %s2414_s24 }
  0x90   : > { %s2416_s7 = scalar_lea.vmem %s2415_s24, 128  ;;  %p2417_p1 = scmp.lt.s32.totalorder %s517_s14, %s2415_s24 }
  0x91   : > { %p2412_p2 = pnand %p2410_p0, %p2370_p11  ;;  %p2418_p8 = scmp.lt.s32.totalorder %s2416_s7, %s2409_s17 }
  0x93   : > { %s515_s1 = scalar_lea.hbm %s3244_s0, %s1953_s23  ;;  %p2413_p6 = pneg %p2412_p2 }
  0x94   : > { %p2419_p12 = por %p2418_p8, %p2417_p1 }
  0x96   : > { %p2420_p4 = pnand %p2419_p12, %p2413_p6 }
  0x98   : > { %2423 = shalt.err (!%p2420_p4)
}
  0x99   : > { %s2595_s29 = smov 32   ;;  %s2596_s8 = smov 2  }
  0x9a   : > { %2117 = dma.hbm_to_vmem [thread:$0]  (!%p2894_p7), %s515_s1, 64, %s517_s14, %s2847_s22, %s2595_s29, %s2595_s29, %s2596_s8  }
  0x9b   : > { %535 = sbr.rel (%p2773_p13) target bundleno = 1774 (0x6ee), region = 72  ;;  %s537_s6 = sand.u32 (!%p2773_p13), 1, %s2560_s15  }
  0x9c   : > { %s1916_s10 = sshll.u32 (!%p2773_p13), %s537_s6, 5  ;;  %s538_s23 = scalar_lea.sflag (!%p2773_p13), [#allocation3], %s537_s6 }
  0x9d   : > { %s2923_s11 = scalar_lea.vmem (!%p2773_p13), [#allocation2], %s1916_s10 }
  0xa0   : > { %2507 = dma.done.wait (%p2748_p3), %s538_s23, 512  }
  0xa1   : > { %2509 = vsyncadd (%p2748_p3), %s538_s23, 4294966784  ;;  %s3247_s7 = sld [smem:[#allocation25_spill]] }
  0xa2   : > { %s3248_s3 = sld [smem:[#allocation22_spill]] }
  0xa7   : > { %s546_s26 = sand.u32 1, %s3247_s7  }
  0xa8   : > { %s548_s1 = sand.u32 1, %s3248_s3   ;;  %s547_s14 = scalar_lea.sflag [#allocation6], %s546_s26 }
  0xa9   : > { %s2931_s22 = sshll.u32 %s548_s1, 4 }
  0xaa   : > { %2511 = dma.done.wait (%p2756_p5), %s547_s14, 256  }
  0xab   : > { %2513 = vsyncadd (%p2756_p5), %s547_s14, 4294967040  ;;  %s1918_s17 = sshll.u32 %s537_s6, 2 }
  0xac   : > { %s2938_s13 = scalar_lea.vmem [#allocation7], %s1918_s17 }
  0xad   : > { %2515 = dma.done.wait (%p2748_p3), %s547_s14, 64  }
  0xae   : > { %2517 = vsyncadd (%p2748_p3), %s547_s14, 4294967232  ;;  %p3250_p13 = scmp.eq.s32.totalorder %s3247_s7, 0 }
  0xb0   : > { %2519 = dma.done.wait (%p3250_p13), [#allocation9], 192   ;;  %p3251_p7 = pmov %p3250_p13 }
  0xb2   : > { %2521 = vsyncadd (%p3251_p7), [#allocation9], 4294967104  ;;  %p3252_p11 = pmov %p3251_p7 }
  0xb3   : > { %p3253_p5 = pmov %p3251_p7 }
  0xb4   : > { %2523 = dma.done.wait (%p3252_p11), [#allocation12], 256  }
  0xb5   : > { %2525 = vsyncadd (%p3253_p5), [#allocation12], 4294967040  ;;  %s3254_s24 = sld [smem:[#allocation24_spill]]  ;;  %v2597_v0 = vmov 0.0   ;;  %vm2598_vm0 = vmmov 0   ;;  %v2967_v1 = vld [vmem:[%s2923_s11 + $0x8] sm:$0xff] }
  0xb6   : > { %s3255_s29 = sld [smem:[#allocation23_spill]]  ;;  %1994 = vmatprep.subr.mxu0 %v2597_v0  ;;  %2001 = vmatprep.subr.mxu1 %v2597_v0  ;;  %v2970_v2 = vld [vmem:[%s2923_s11 + $0x18] sm:$0xff]  ;;  %v2973_v3 = vld [vmem:[%s2923_s11] sm:$0xff]  ;;  %v2981_v4 = vld [vmem:[%s2923_s11 + $0x10] sm:$0xff]  ;;  %vm661_vm1 = vcmask 130048  }
  0xb7   : > { %1998 = vmatprep.mubr.msk.f32.mxu0 %vm2598_vm0, %v2597_v0  ;;  %2005 = vmatprep.mubr.msk.f32.mxu1 %vm2598_vm0, %v2597_v0  ;;  %s3256_s23 = sld [smem:[#allocation34_spill]]  ;;  %v660_v6 = vld [vmem:[#allocation11 + $0x8] sm:$0xff]  ;;  %v659_v7 = vld [vmem:[#allocation11] sm:$0xff] }
  0xb8   : > { %s3257_s26 = sld [smem:[#allocation35_spill]]  ;;  %1995 = vmatpush3.msra.mxu0 %v2967_v1  ;;  %2002 = vmatpush3.msra.mxu1 %v2970_v2 }
  0xb9   : > { %1996 = vmatprep.subr.mxu0 %v2597_v0  ;;  %2003 = vmatprep.subr.mxu1 %v2597_v0  ;;  %s3261_s0 = sld [smem:[#allocation21_spill]] }
  0xba   : > { %1997 = vmatpush3.msra.mxu0 %v2973_v3  ;;  %2004 = vmatpush3.msra.mxu1 %v2981_v4 }
  0xbb   : > { %p637_p9 = scmp.lt.s32.totalorder %s3254_s24, 1  ;;  %2008 = vmatprep.subr.mxu0 %v660_v6 }
  0xbc   : > { %p647_p3 = scmp.lt.s32.totalorder %s3255_s29, 1  ;;  %p1934_p10 = scmp.ne.s32.totalorder %s3255_s29, 0 }
  0xbd   : > { %s3301_s24 = smov (!%p637_p9, %s3254_s24), 1  ;;  %s3263_s28 = sld [smem:[#allocation43_spill]] (!%p1934_p10) }
  0xbe   : > { %s648_s8 = scalar_select %p647_p3, %s3255_s29, 1 }
  0xbf   : > { %s1954_s5 = sshll.u32 %s3301_s24, 4  ;;  %s1955_s2 = sshll.u32 %s3301_s24, 3 }
  0xc0   : > { %s2959_s7 = scalar_lea.vmem %s3256_s23, %s1954_s5  ;;  %s2964_s1 = scalar_lea.vmem %s3257_s26, %s1955_s2 }
  0xc1   : > { %s1926_s14 = sshll.u32 %s648_s8, 3  ;;  %s3258_s24 = sld [smem:[#allocation37_spill]] }
  0xc2   : > { %s3262_s2 = sld [smem:[#allocation42_spill]] (!%p1934_p10) }
  0xc3   : > { %s3266_s29 = sld [smem:[#allocation44_spill]] (!%p1934_p10) }
  0xc7   : > { %s650_s9 = scalar_lea.vmem %s3258_s24, %s1926_s14  ;;  %s3264_s24 = smov (!%p1934_p10), %s3263_s28 }
  0xc8   : > { %v658_v5 = vld [vmem:[%s650_s9] sm:$0xff]  ;;  %s3259_s9 = scalar_lea.vmem [#allocation5], %s2931_s22  ;;  %s635_s22 = sand.u32 1, %s3261_s0  }
  0xc9   : > { %1999 = vmatmul.mubr.msk.f32.vlgmr.msra.gmra.mxu0 %vm661_vm1, %v658_v5  ;;  %2006 = vmatmul.mubr.msk.f32.vlgmr.msra.gmra.mxu1 %vm661_vm1, %v658_v5  ;;  %v1933_v12 = vld [vmem:[%s3259_s9 + $0x8] sm:$0xff]  ;;  %s3260_s11 = smov %s3259_s9  ;;  %s2997_s8 = scalar_lea.vmem [#allocation13], %s635_s22 }
  0xca   : > { %2009 = vmatpush3.msra.mxu0 %v660_v6  ;;  %v886_v14 = vld [vmem:[%s3260_s11] sm:$0xff]  ;;  %s3265_s11 = sld [smem:[#allocation40_spill]] (!%p1934_p10)  ;;  %s3267_s5 = smov (!%p1934_p10), %s3266_s29 }
  0xcb   : > { %2010 = vmatprep.subr.mxu0 %v659_v7 }
  0xcc   : > { %2011 = vmatpush3.msra.mxu0 %v659_v7 }
 0x189   : > { %v731_v8 = vpop.f32.mrf.mxu0  ;;  %v801_v9 = vpop.f32.mrf.mxu1 }
 0x18a   : > { %2012 = vmatprep.mubr.msk.f32.mxu0 %vm661_vm1, %v731_v8 }
 0x18b   : > { %v2000_v10 = vpop.f32.mrf.mxu0  ;;  %v2007_v11 = vpop.f32.mrf.mxu1  ;;  %2013 = vmatmul.mubr.msk.f32.vlgmr.msra.gmra.mxu0 %vm661_vm1, %v801_v9 }
 0x24b   : > { %v2014_v13 = vpop.f32.mrf.mxu0 }
 0x24c   : > { %v892_v15 = vsub.f32 %v2014_v13, %v1933_v12 }
 0x24d   : > { %v877_v16 = vpop.f32.mrf.mxu0 }
 0x24e   : > { %v887_v17 = vsub.f32 %v877_v16, %v886_v14  ;;  %v893_v18 = vmul.f32 %v892_v15, %v892_v15 }
 0x250   : > { %v888_v19 = vmul.f32 %v887_v17, %v887_v17 }
 0x252   : > { %v894_v20 = vadd.f32 %v893_v18, %v888_v19 }
 0x254   : > { %2254 = vrsqrt.f32 %v894_v20  ;;  %vm897_vm2 = vcmp.eq.f32.partialorder %v894_v20, inf  ;;  %v900_v23 = vand.u32 2147483648, %v894_v20  ;;  %vm899_vm3 = vcmp.eq.f32.partialorder %v894_v20, 0.0 }
 0x261   : > { %v2255_v21 = vpop.eup %2254 }
 0x262   : > { %v896_v22 = vmul.f32 %v2255_v21, %v894_v20 }
 0x264   : > { %v898_v24 = vsel %vm897_vm2, %v894_v20, %v896_v22 }
 0x265   : > { %v901_v25 = vsel %vm899_vm3, %v900_v23, %v898_v24 }
 0x266   : > { %v902_v26 = vsel %vm661_vm1, %v901_v25, 0.0 }
 0x267   : > { %903 = vadd.xlane.f32.xlu0 %v902_v26 }
 0x2f0   : > { %v904_v27 = vpop.xlane.xlu0 %903 }
 0x2f1   : > { %v905_v28 = vrot.slane %v904_v27, 4 }
 0x2f3   : > { %v906_v29 = vadd.f32 %v905_v28, %v904_v27 }
 0x2f5   : > { %v907_v30 = vrot.slane %v906_v29, 2 }
 0x2f7   : > { %v908_v31 = vadd.f32 %v907_v30, %v906_v29 }
 0x2f9   : > { %v909_v32 = vrot.slane %v908_v31, 1 }
 0x2fb   : > { %v910_v33 = vadd.f32 %v909_v32, %v908_v31  ;;  %916 = sbr.rel (%p1934_p10) target bundleno = 1746 (0x6d2), region = 100 }
 0x2fd   : > { %v911_v34 = vmul.f32 0.001953125, %v910_v33 }
 0x2ff   : > { %912 = vst [vmem:[%s2997_s8] sm:$0x1] %v911_v34 }
 0x300   : > { %v2599_v35 = vmov 0.0   ;;  %v917_v36 = vld [vmem:[#allocation8] sm:$0xff]  ;;  %vm2600_vm4 = vmmov 0   ;;  %v918_v38 = vld [vmem:[%s3262_s2] sm:$0xff]  ;;  %v1172_v39 = vld [vmem:[#allocation10] sm:$0xf] }
 0x301   : > { %2015 = vmatprep.subr.mxu0 %v2599_v35  ;;  %2022 = vmatprep.subr.mxu1 %v2599_v35  ;;  %v919_v37 = vld [vmem:[%s3262_s2 + $0x8] sm:$0xff]  ;;  %v1173_v47 = vld [vmem:[%s3264_s24] sm:$0xff]  ;;  %vm1321_vm5 = vcmask 1043456   ;;  %vm1580_vm6 = vcmask 1041408   ;;  %vm1418_vm8 = vcmask 27648   ;;  %vm1160_vm12 = vcmask 64512  }
 0x302   : > { %2016 = vmatpush3.msra.mxu0 %v2967_v1  ;;  %2023 = vmatpush3.msra.mxu1 %v2970_v2  ;;  %v1174_v45 = vld [vmem:[%s3263_s28 + $0x8] sm:$0xff]  ;;  %v1431_v48 = vld [vmem:[%s3265_s11] sm:$0x3]  ;;  %v1947_v29 = vld [vmem:[%s2938_s13 + $0x2] sm:$0x3]  ;;  %vm1677_vm14 = vcmask 9216  }
 0x303   : > { %2017 = vmatprep.subr.mxu0 %v2599_v35  ;;  %2024 = vmatprep.subr.mxu1 %v2599_v35  ;;  %v1939_v49 = vld [vmem:[%s2959_s7 + $0x8] sm:$0xff]  ;;  %v1144_v51 = vld [vmem:[%s2959_s7] sm:$0xff]  ;;  %v1662_v30 = vrot.slane %v1947_v29, 6 }
 0x304   : > { %2018 = vmatpush3.msra.mxu0 %v2973_v3  ;;  %2019 = vmatprep.mubr.msk.f32.mxu0 %vm2600_vm4, %v2599_v35  ;;  %v1433_v63 = vld [vmem:[%s3266_s29 + $0x8] sm:$0xff]  ;;  %v1396_v5 = vld [vmem:[%s2964_s1] sm:$0xf] }
 0x305   : > { %2025 = vmatpush3.msra.mxu1 %v2981_v4  ;;  %2026 = vmatprep.mubr.msk.f32.mxu1 %vm2600_vm4, %v2599_v35  ;;  %v1655_v31 = vld [vmem:[%s2938_s13] sm:$0x3] }
 0x306   : > { %2020 = vmatmul.mubr.msk.f32.vlgmr.msra.gmra.mxu0 %vm661_vm1, %v917_v36  ;;  %2027 = vmatmul.mubr.msk.f32.vlgmr.msra.gmra.mxu1 %vm661_vm1, %v917_v36 }
 0x307   : > { %2029 = vmatprep.subr.mxu0 %v919_v37  ;;  %2036 = vmatprep.subr.mxu1 %v2599_v35 }
 0x308   : > { %2030 = vmatpush3.msra.mxu0 %v919_v37  ;;  %2037 = vmatpush3.msra.mxu1 %v2967_v1 }
 0x309   : > { %2031 = vmatprep.subr.mxu0 %v918_v38  ;;  %2038 = vmatprep.subr.mxu1 %v2599_v35 }
 0x30a   : > { %2032 = vmatpush3.msra.mxu0 %v918_v38  ;;  %2039 = vmatpush3.msra.mxu1 %v2973_v3 }
 0x30b   : > { %2043 = vmatprep.subr.mxu0 %v2599_v35  ;;  %2040 = vmatprep.mubr.msk.f32.mxu1 %vm2600_vm4, %v2599_v35 }
 0x30c   : > { %2050 = vmatprep.subr.mxu1 %v2599_v35  ;;  %2041 = vmatmul.mubr.msk.f32.vlgmr.msra.gmra.mxu1 %vm661_vm1, %v1172_v39 }
 0x30d   : > { %2054 = vmatprep.mubr.msk.f32.mxu1 %vm2600_vm4, %v2599_v35  ;;  %2051 = vmatpush3.msra.mxu1 %v1174_v45 }
 0x30e   : > { %2052 = vmatprep.subr.mxu1 %v2599_v35 }
 0x30f   : > { %2053 = vmatpush3.msra.mxu1 %v1173_v47 }
 0x310   : > { %2064 = vmatprep.subr.mxu1 %v2599_v35 }
 0x3c6   : > { %v989_v40 = vpop.f32.mrf.mxu0  ;;  %v1059_v41 = vpop.f32.mrf.mxu1 }
 0x3c7   : > { %2033 = vmatprep.mubr.msk.f32.mxu0 %vm661_vm1, %v989_v40 }
 0x3c8   : > { %v2021_v42 = vpop.f32.mrf.mxu0  ;;  %v2028_v43 = vpop.f32.mrf.mxu1  ;;  %2034 = vmatmul.mubr.msk.f32.vlgmr.msra.gmra.mxu0 %vm661_vm1, %v1059_v41 }
 0x3c9   : > { %2044 = vmatpush3.msra.mxu0 %v2970_v2  ;;  %2047 = vmatprep.mubr.msk.f32.mxu0 %vm2600_vm4, %v2599_v35 }
 0x3ca   : > { %2045 = vmatprep.subr.mxu0 %v2599_v35 }
 0x3cb   : > { %2046 = vmatpush3.msra.mxu0 %v2981_v4 }
 0x3cc   : > { %2048 = vmatmul.mubr.msk.f32.vlgmr.msra.gmra.mxu0 %vm661_vm1, %v1172_v39  ;;  %2057 = vmatprep.subr.mxu0 %v2599_v35  ;;  %v1244_v44 = vpop.f32.mrf.mxu1 }
 0x3cd   : > { %2058 = vmatpush3.msra.mxu0 %v2967_v1  ;;  %2061 = vmatprep.mubr.msk.f32.mxu0 %vm2600_vm4, %v2599_v35  ;;  %v1432_v1 = vld [vmem:[%s3267_s5] sm:$0xff] }
 0x3ce   : > { %2059 = vmatprep.subr.mxu0 %v2599_v35  ;;  %v2042_v46 = vpop.f32.mrf.mxu1 }
 0x3cf   : > { %2060 = vmatpush3.msra.mxu0 %v2973_v3 }
 0x3d0   : > { %2071 = vmatprep.subr.mxu0 %v2599_v35  ;;  %2062 = vmatmul.mubr.msk.f32.vlgmr.msra.gmra.mxu0 %vm661_vm1, %v1431_v48 }
 0x3d1   : > { %2075 = vmatprep.mubr.msk.f32.mxu0 %vm2600_vm4, %v2599_v35  ;;  %2072 = vmatpush3.msra.mxu0 %v1433_v63 }
 0x3d2   : > { %2073 = vmatprep.subr.mxu0 %v2599_v35 }
 0x3d3   : > { %2074 = vmatpush3.msra.mxu0 %v1432_v1 }
 0x488   : > { %v2035_v50 = vpop.f32.mrf.mxu0 }
 0x489   : > { %v1150_v52 = vsub.f32 %v2035_v50, %v1939_v49 }
 0x48a   : > { %v1135_v53 = vpop.f32.mrf.mxu0 }
 0x48b   : > { %v1145_v54 = vsub.f32 %v1135_v53, %v1144_v51  ;;  %v1151_v56 = vmul.f32 %v1150_v52, %v1150_v52 }
 0x48c   : > { %v1314_v55 = vpop.f32.mrf.mxu0 }
 0x48d   : > { %v1146_v57 = vmul.f32 %v1145_v54, %v1145_v54  ;;  %v1319_v58 = vrot.slane %v1314_v55, 4 }
 0x48e   : > { %v2049_v59 = vpop.f32.mrf.mxu0 }
 0x48f   : > { %v1152_v60 = vadd.f32 %v1151_v56, %v1146_v57  ;;  %v1322_v61 = vsel %vm1321_vm5, %v1244_v44, %v1319_v58 }
 0x490   : > { %2055 = vmatmul.mubr.msk.f32.vlgmr.msra.gmra.mxu1 %vm661_vm1, %v1322_v61  ;;  %v1503_v62 = vpop.f32.mrf.mxu0 }
 0x491   : > { %2065 = vmatpush3.msra.mxu1 %v2970_v2  ;;  %2068 = vmatprep.mubr.msk.f32.mxu1 %vm2600_vm4, %v2599_v35  ;;  %v1943_v2 = vld [vmem:[%s2964_s1 + $0x4] sm:$0xf]  ;;  %2256 = vrsqrt.f32 %v1152_v60  ;;  %vm1155_vm9 = vcmp.eq.f32.partialorder %v1152_v60, inf  ;;  %v1158_v25 = vand.u32 2147483648, %v1152_v60  ;;  %vm1157_vm11 = vcmp.eq.f32.partialorder %v1152_v60, 0.0 }
 0x492   : > { %2066 = vmatprep.subr.mxu1 %v2599_v35  ;;  %v2063_v0 = vpop.f32.mrf.mxu0  ;;  %v1403_v3 = vrot.slane %v1943_v2, 4 }
 0x493   : > { %2067 = vmatpush3.msra.mxu1 %v2981_v4 }
 0x494   : > { %2069 = vmatmul.mubr.msk.f32.vlgmr.msra.gmra.mxu1 %vm661_vm1, %v1431_v48 }
 0x49e   : > { %v2257_v17 = vpop.eup %2256 }
 0x49f   : > { %v1154_v18 = vmul.f32 %v2257_v17, %v1152_v60 }
 0x4a1   : > { %v1156_v23 = vsel %vm1155_vm9, %v1152_v60, %v1154_v18 }
 0x4a2   : > { %v1159_v27 = vsel %vm1157_vm11, %v1158_v25, %v1156_v23 }
 0x4a3   : > { %v1161_v28 = vsel %vm1160_vm12, %v1159_v27, 0.0 }
 0x550   : > { %v1392_v4 = vpop.f32.mrf.mxu1 }
 0x551   : > { %v1397_v6 = vsub.f32 %v1392_v4, %v1396_v5  ;;  %v1405_v7 = vsub.f32 %v1392_v4, %v1403_v3 }
 0x552   : > { %v2056_v8 = vpop.f32.mrf.mxu1 }
 0x553   : > { %v1406_v9 = vmul.f32 %v1405_v7, %v1405_v7  ;;  %v1398_v11 = vmul.f32 %v1397_v6, %v1397_v6 }
 0x554   : > { %v1573_v10 = vpop.f32.mrf.mxu1 }
 0x555   : > { %v1408_v12 = vrot.slane %v1406_v9, 4  ;;  %v1578_v13 = vrot.slane %v1573_v10, 6  ;;  %v1690_v9 = vld [vmem:[%s2997_s8] sm:$0x1] }
 0x556   : > { %v2070_v14 = vpop.f32.mrf.mxu1 }
 0x557   : > { %v1410_v15 = vadd.f32 %v1408_v12, %v1398_v11  ;;  %v1581_v16 = vsel %vm1580_vm6, %v1503_v62, %v1578_v13 }
 0x558   : > { %2076 = vmatmul.mubr.msk.f32.vlgmr.msra.gmra.mxu0 %vm661_vm1, %v1581_v16 }
 0x559   : > { %2258 = vrsqrt.f32 %v1410_v15  ;;  %vm1413_vm7 = vcmp.eq.f32.partialorder %v1410_v15, inf  ;;  %v1416_v21 = vand.u32 2147483648, %v1410_v15  ;;  %vm1415_vm10 = vcmp.eq.f32.partialorder %v1410_v15, 0.0 }
 0x566   : > { %v2259_v19 = vpop.eup %2258 }
 0x567   : > { %v1412_v20 = vmul.f32 %v2259_v19, %v1410_v15 }
 0x569   : > { %v1414_v22 = vsel %vm1413_vm7, %v1410_v15, %v1412_v20 }
 0x56a   : > { %v1417_v24 = vsel %vm1415_vm10, %v1416_v21, %v1414_v22 }
 0x56b   : > { %v1419_v26 = vsel %vm1418_vm8, %v1417_v24, 0.0 }
 0x56c   : > { %1420 = vadd.xlane.f32.xlu0 %v1419_v26 }
 0x570   : > { %1162 = vadd.xlane.f32.xlu0 %v1161_v28 }
 0x5f5   : > { %v1421_v46 = vpop.xlane.xlu0 %1420 }
 0x5f6   : > { %v1422_v48 = vsel %vm1321_vm5, %v1421_v46, 0.0 }
 0x5f7   : > { %v1423_v50 = vrot.slane %v1422_v48, 4 }
 0x5f9   : > { %v1163_v47 = vpop.xlane.xlu0 %1162  ;;  %v1424_v52 = vadd.f32 %v1423_v50, %v1422_v48 }
 0x5fa   : > { %v1164_v49 = vrot.slane %v1163_v47, 4 }
 0x5fb   : > { %v1425_v54 = vrot.slane %v1424_v52, 2 }
 0x5fc   : > { %v1165_v51 = vadd.f32 %v1164_v49, %v1163_v47 }
 0x5fd   : > { %v1426_v56 = vadd.f32 %v1425_v54, %v1424_v52 }
 0x5fe   : > { %v1166_v53 = vrot.slane %v1165_v51, 2 }
 0x5ff   : > { %v1427_v61 = vrot.slane %v1426_v56, 1 }
 0x600   : > { %v1167_v55 = vadd.f32 %v1166_v53, %v1165_v51 }
 0x601   : > { %v1428_v1 = vadd.f32 %v1427_v61, %v1426_v56 }
 0x602   : > { %v1168_v59 = vrot.slane %v1167_v55, 1 }
 0x603   : > { %v1429_v4 = vmul.f32 0.03125, %v1428_v1 }
 0x604   : > { %v1169_v63 = vadd.f32 %v1168_v59, %v1167_v55 }
 0x606   : > { %v1170_v3 = vmul.f32 0.0078125, %v1169_v63 }
 0x608   : > { %v1430_v7 = vadd.f32 %v1429_v4, %v1170_v3 }
 0x618   : > { %v1651_v32 = vpop.f32.mrf.mxu0 }
 0x619   : > { %v1656_v33 = vsub.f32 %v1651_v32, %v1655_v31  ;;  %v1664_v34 = vsub.f32 %v1651_v32, %v1662_v30 }
 0x61a   : > { %v2077_v35 = vpop.f32.mrf.mxu0 }
 0x61b   : > { %v1665_v36 = vmul.f32 %v1664_v34, %v1664_v34  ;;  %v1657_v37 = vmul.f32 %v1656_v33, %v1656_v33 }
 0x61d   : > { %v1667_v38 = vrot.slane %v1665_v36, 2 }
 0x61f   : > { %v1669_v39 = vadd.f32 %v1667_v38, %v1657_v37 }
 0x621   : > { %2260 = vrsqrt.f32 %v1669_v39  ;;  %vm1672_vm13 = vcmp.eq.f32.partialorder %v1669_v39, inf  ;;  %v1675_v42 = vand.u32 2147483648, %v1669_v39  ;;  %vm1674_vm15 = vcmp.eq.f32.partialorder %v1669_v39, 0.0 }
 0x62e   : > { %v2261_v40 = vpop.eup %2260 }
 0x62f   : > { %v1671_v41 = vmul.f32 %v2261_v40, %v1669_v39 }
 0x631   : > { %v1673_v43 = vsel %vm1672_vm13, %v1669_v39, %v1671_v41 }
 0x632   : > { %v1676_v44 = vsel %vm1674_vm15, %v1675_v42, %v1673_v43 }
 0x633   : > { %v1678_v45 = vsel %vm1677_vm14, %v1676_v44, 0.0 }
 0x634   : > { %1679 = vadd.xlane.f32.xlu1 %v1678_v45 }
 0x6bd   : > { %v1680_v57 = vpop.xlane.xlu1 %1679 }
 0x6be   : > { %v1681_v58 = vsel %vm1580_vm6, %v1680_v57, 0.0 }
 0x6bf   : > { %v1682_v60 = vrot.slane %v1681_v58, 4 }
 0x6c1   : > { %v1683_v62 = vadd.f32 %v1682_v60, %v1681_v58 }
 0x6c3   : > { %v1684_v0 = vrot.slane %v1683_v62, 2 }
 0x6c5   : > { %v1685_v2 = vadd.f32 %v1684_v0, %v1683_v62 }
 0x6c7   : > { %v1686_v5 = vrot.slane %v1685_v2, 1 }
 0x6c9   : > { %v1687_v6 = vadd.f32 %v1686_v5, %v1685_v2 }
 0x6cb   : > { %v1688_v8 = vmul.f32 0.125, %v1687_v6 }
 0x6cd   : > { %v1689_v10 = vadd.f32 %v1688_v8, %v1430_v7 }
 0x6cf   : > { %v1691_v11 = vadd.f32 %v1690_v9, %v1689_v10 }
 0x6d1   : > { %1692 = vst [vmem:[%s2997_s8] sm:$0x1] %v1691_v11 }
 0x6d2 PF: > { %s3268_s13 = sld [smem:[#allocation24_spill]]  ;;  %s1708_s14 = sshll.u32 %s2997_s8, 4  ;;  %s1709_s14 = int_to_ptr.vmem [resolvable:$true] %s1708_s14 }
 0x6d3   : > { %s3269_s1 = sld [smem:[#allocation23_spill]]  ;;  %s1694_s29 = scalar_lea.sflag [#allocation4], %s635_s22 }
 0x6d4   : > { %s3271_s3 = sld [smem:[#allocation28_spill]]  ;;  %s2424_s6 = scalar_lea.vmem %s1709_s14, 16 }
 0x6d5   : > { %s3272_s7 = sld [smem:[#allocation45_spill]]  ;;  %p2425_p0 = scmp.ne.s32.totalorder %s1709_s14, %s2424_s6 }
 0x6d6   : > { %s2601_s10 = smov [#allocation13]  }
 0x6d7   : > { %s2428_s2 = sshll.u32 %s2601_s10, 4  ;;  %s2429_s2 = int_to_ptr.vmem [resolvable:$false] %s2428_s2 }
 0x6d8   : > { %s1948_s28 = sshll.u32 %s3268_s13, 1  ;;  %s2430_s5 = scalar_lea.vmem %s2429_s2, 32 }
 0x6d9   : > { %s1701_s26 = sadd.s32 %s3269_s1, %s1948_s28  ;;  %p2431_p8 = scmp.lt.s32.totalorder %s1709_s14, %s2429_s2 }
 0x6da   : > { %s1949_s17 = sshll.u32 %s1701_s26, 4  ;;  %p3273_p2 = scmp.ne.s32.totalorder %s3271_s3, 0 }
 0x6db   : > { %s1706_s0 = scalar_lea.hbm %s3272_s7, %s1949_s17  ;;  %p2432_p12 = scmp.lt.s32.totalorder %s2430_s5, %s2424_s6 }
 0x6dc   : > { %p2426_p6 = pnand %p2425_p0, %p3273_p2 }
 0x6dd   : > { %p2433_p4 = por %p2432_p12, %p2431_p8 }
 0x6de   : > { %p2427_p1 = pneg %p2426_p6 }
 0x6e0   : > { %p2434_p13 = pnand %p2433_p4, %p2427_p1 }
 0x6e2   : > { %2437 = shalt.err (!%p2434_p13)
}
 0x6e3   : > { %s2438_s8 = scalar_lea.hbm %s1706_s0, 16  ;;  %s2442_s1 = scalar_lea.hbm %s3272_s7, 64 }
 0x6e4   : > { %p2439_p7 = scmp.ne.s32.totalorder %s1706_s0, %s2438_s8  ;;  %p2443_p9 = scmp.lt.s32.totalorder %s1706_s0, %s3272_s7 }
 0x6e5   : > { %p2444_p3 = scmp.lt.s32.totalorder %s2442_s1, %s2438_s8 }
 0x6e6   : > { %p2440_p11 = pnand %p2439_p7, %p3273_p2 }
 0x6e7   : > { %p2445_p10 = por %p2444_p3, %p2443_p9 }
 0x6e8   : > { %p2441_p5 = pneg %p2440_p11 }
 0x6ea   : > { %p2446_p0 = pnand %p2445_p10, %p2441_p5 }
 0x6ec   : > { %2449 = shalt.err (!%p2446_p0)
}
 0x6ed   : > { %2096 = dma.vmem_to_hbm [thread:$0]  (%p3273_p2), %s1709_s14, 16, %s1706_s0, %s1694_s29  }
 0x6ee PF: > { %s3274_s2 = sld [smem:[#allocation20_spill]]  ;;  %p2129_p6 = scmp.ge.s32.totalorder %s2584_s21, 2 }
 0x6ef   : > { %s3275_s5 = sld [smem:[#allocation29_spill]] }
 0x6f4   : > { %s1720_s26 = sand.u32 1, %s3274_s2  }
 0x6f5   : > { %p3276_p1 = scmp.ne.s32.totalorder %s3275_s5, 0  ;;  %s1721_s17 = scalar_lea.sflag [#allocation4], %s1720_s26 }
 0x6f7   : > { %p2119_p8 = pnand %p2129_p6, %p3276_p1 }
 0x6f9   : > { %p2120_p12 = pneg %p2119_p8 }
 0x6fb   : > { %2527 = dma.done.wait (%p2120_p12), %s1721_s17, 16  }
 0x6fc   : > { %2529 = vsyncadd (%p2120_p12), %s1721_s17, 4294967280  ;;  %s34_s21 = sadd.s32 1, %s2584_s21   ;;  %s3278_s3 = sld [smem:[#allocation21_spill]] }
 0x6fd   : > { %p3113_p4 = scmp.ge.s32.totalorder %s34_s21, 6   ;;  %s3279_s28 = sld [smem:[#allocation22_spill]] }
 0x6fe   : > { %s3280_s11 = smov %s3295_s25  ;;  %s3281_s0 = sld [smem:[#allocation31_spill]] }
 0x6ff   : > { %s3283_s26 = smov %s2540_s27  ;;  %s3284_s27 = smov %s2830_s12 }
 0x700   : > { %s3285_s29 = smov %s2552_s30  ;;  %s3286_s30 = smov %s2825_s18 }
 0x701   : > { %s3287_s14 = smov %s2560_s15  ;;  %s3288_s15 = smov %s2564_s16 }
 0x702   : > { %s3282_s25 = smov %s3278_s3  ;;  %s3289_s16 = smov %s2883_s4 }
 0x703   : > { %s3290_s17 = smov %s2576_s19  ;;  %s3291_s18 = smov %s2580_s20 }
 0x704   : > { %s3292_s19 = smov %s3280_s11  ;;  %s3293_s20 = smov %s3281_s0 }
 0x705   :  { %33 = sbr.rel (!%p3113_p4) target bundleno = 29 (0x1d), region = 171 }
 0x70a   :  { %1725 = vsyncpa [#allocation3], 1 }
 0x70b   :  { %1727 = vsyncpa [#allocation3 + $0x1], 1 }
 0x70c   :  { %1728 = vsyncpa [#allocation6], 1 }
 0x70d   :  { %1730 = vsyncpa [#allocation6 + $0x1], 1 }
 0x70e   :  { %1731 = vsyncpa [#allocation9], 1 }
 0x70f   :  { %1732 = vsyncpa [#allocation12], 1 }
 0x710   :  { %1733 = vsyncpa [#allocation4], 1 }
 0x711   :  { %1735 = vsyncpa [#allocation4 + $0x1], 1 }

</bundles_post_ra>
